<compile_context>
chip_gen: v5e
topology: v5e:2x2
jax: 0.10.0
libtpu: 0.0.40
codegen_flags: <defaults>
</compile_context>

<pallas_src>
import functools

import jax
import jax.numpy as jnp
from jax.experimental import pallas as pl
from jax.experimental.pallas import tpu as pltpu

_INV_SQRT2 = 0.7071067811865476  # 1/sqrt(2), hoisted constant


def _round_up(x, m):
    return (x + m - 1) // m * m


def _timestep_embedding_kernel(x_ref, w1_ref, b1_ref, w2_ref, b2_ref, o_ref,
                               *, compute_dtype):
    # linear_1: (tm, Cin) @ (Cin, D) -> f32 accumulator, + f32 bias.
    # Cast to bf16 in VMEM (VPU work, hidden under MXU/DMA) so the MXU runs at
    # its bf16 rate while HBM traffic stays one f32 pass per operand.
    h = jnp.dot(x_ref[...].astype(compute_dtype),
                w1_ref[...].astype(compute_dtype),
                preferred_element_type=jnp.float32)
    h = h + b1_ref[...]
    # exact (erf-based) GELU in f32, matching torch.nn.GELU() default
    h = 0.5 * h * (1.0 + jax.lax.erf(h * _INV_SQRT2))
    # linear_2: (tm, D) @ (D, tn) -> f32 accumulator, + f32 bias
    o = jnp.dot(h.astype(compute_dtype),
                w2_ref[...].astype(compute_dtype),
                preferred_element_type=jnp.float32)
    o = o + b2_ref[...]
    o_ref[...] = o.astype(o_ref.dtype)


@functools.partial(jax.jit, static_argnames=("tm", "tn", "compute_dtype"))
def timestep_embedding(x, w1, b1, w2, b2, *, tm=None, tn=None,
                       compute_dtype=jnp.bfloat16):
    """x: (B, Cin); w1: (Cin, D); b1: (1, D) or (D,); w2: (D, D); b2: (1, D)."""
    B, Cin = x.shape
    D = w1.shape[1]
    out_dtype = x.dtype
    b1 = b1.reshape(1, D).astype(jnp.float32)
    b2 = b2.reshape(1, D).astype(jnp.float32)

    # ---- tile sizes -------------------------------------------------------
    if tm is None:
        if B <= 8:
            tm = B                                  # full-dim block, always legal
        else:
            tm = min(256, _round_up(B, 8))
            if pl.cdiv(B, tm) < 2:
                # keep >= 2 grid steps on the (parallel) batch axis so both
                # v7x TensorCores get work.
                tm = _round_up(pl.cdiv(B, 2), 8)
    if tn is None:
        # keep w2 fully resident unless a (D, D) f32 block would crowd v7x VMEM
        tn = D if D * D * 4 <= (20 << 20) else 512
    n_tiled = tn < D

    # grid: (N-tile axis outer, batch-tile axis inner) so a given w2 N-tile is
    # reused across all batch tiles before moving on.
    grid = (pl.cdiv(D, tn), pl.cdiv(B, tm))

    resident = pl.Buffered(1)  # constant index_map -> never re-DMAed, 1 buffer
    x_spec = pl.BlockSpec((tm, Cin), lambda j, i: (i, 0))
    w1_spec = pl.BlockSpec((Cin, D), lambda j, i: (0, 0),
                           pipeline_mode=resident)
    b1_spec = pl.BlockSpec((1, D), lambda j, i: (0, 0),
                           pipeline_mode=resident)
    if n_tiled:
        # w2/b2 blocks change with j -> keep default double-buffering
        w2_spec = pl.BlockSpec((D, tn), lambda j, i: (0, j))
        b2_spec = pl.BlockSpec((1, tn), lambda j, i: (0, j))
    else:
        w2_spec = pl.BlockSpec((D, tn), lambda j, i: (0, j),
                               pipeline_mode=resident)
        b2_spec = pl.BlockSpec((1, tn), lambda j, i: (0, j),
                               pipeline_mode=resident)
    out_spec = pl.BlockSpec((tm, tn), lambda j, i: (i, j))

    # ---- explicit scoped-VMEM budget --------------------------------------
    w2_bufs = 2 if n_tiled else 1
    w_bytes = (Cin * D + D) * 4 + (D * tn + tn) * 4 * w2_bufs   # f32 operands
    act_bytes = 2 * tm * Cin * 4 + 2 * tm * tn * 4              # x / out bufs
    # in-kernel temporaries: bf16 copies of the MXU operands + f32/bf16 h + o
    cbytes = jnp.dtype(compute_dtype).itemsize
    tmp_bytes = ((tm * Cin + Cin * D + D * tn + tm * D) * cbytes
                 + tm * D * 4 + tm * tn * 4)
    vmem_limit = int(1.4 * (w_bytes + act_bytes + tmp_bytes)) + (2 << 20)
    vmem_limit = max(32 << 20, min(vmem_limit, 100 << 20))

    kernel = functools.partial(_timestep_embedding_kernel,
                               compute_dtype=compute_dtype)
    return pl.pallas_call(
        kernel,
        out_shape=jax.ShapeDtypeStruct((B, D), out_dtype),
        grid_spec=pltpu.PrefetchScalarGridSpec(
            num_scalar_prefetch=0,
            grid=grid,
            in_specs=[x_spec, w1_spec, b1_spec, w2_spec, b2_spec],
            out_specs=out_spec,
        ),
        compiler_params=pltpu.CompilerParams(
            dimension_semantics=("parallel", "parallel"),
            vmem_limit_bytes=vmem_limit),
    )(x, w1, b1, w2, b2)


def reference(x, w1, b1, w2, b2):
    h = x @ w1 + b1.reshape(1, -1)
    h = jax.nn.gelu(h, approximate=False)
    return h @ w2 + b2.reshape(1, -1)


if __name__ == "__main__":
    # Small shapes consistent with the module: batch=8 timesteps,
    # in_channels=32, time_embed_dim=128.
    B, Cin, D = 8, 32, 128
    key = jax.random.PRNGKey(0)
    kx, kw1, kb1, kw2, kb2 = jax.random.split(key, 5)

    x = jax.random.normal(kx, (B, Cin), dtype=jnp.float32)
    # nn.Linear stores weight as (out, in); we keep the transposed (in, out)
    # layout so the kernel does x @ W directly.
    w1 = jax.random.normal(kw1, (Cin, D), dtype=jnp.float32) * 0.02
    b1 = jax.random.normal(kb1, (1, D), dtype=jnp.float32) * 0.02
    w2 = jax.random.normal(kw2, (D, D), dtype=jnp.float32) * 0.02
    b2 = jax.random.normal(kb2, (1, D), dtype=jnp.float32) * 0.02

    out = timestep_embedding(x, w1, b1, w2, b2)
    out = jax.block_until_ready(out)

    ref = reference(x, w1, b1, w2, b2)
    assert out.shape == (B, D), out.shape
    # bf16 MXU inputs (f32 accumulation) -> loosened tolerance vs f32 reference
    assert jnp.allclose(out, ref, atol=1e-2, rtol=1e-2), "mismatch vs reference"
    print("KERNEL_OK")
</pallas_src>

<mosaic_0001>
module attributes {stable_mosaic.version = 11 : i64} {
  func.func @_timestep_embedding_kernel(%arg0: i32, %arg1: i32, %arg2: memref<8x32xf32, #tpu.memory_space<vmem>>, %arg3: memref<32x128xf32, #tpu.memory_space<vmem>>, %arg4: memref<1x128xf32, #tpu.memory_space<vmem>>, %arg5: memref<128x128xf32, #tpu.memory_space<vmem>>, %arg6: memref<1x128xf32, #tpu.memory_space<vmem>>, %arg7: memref<8x128xf32, #tpu.memory_space<vmem>>) attributes {dimension_semantics = [#tpu.dimension_semantics<parallel>, #tpu.dimension_semantics<parallel>], iteration_bounds = array<i64: 1, 1>, scalar_prefetch = 0 : i64, scratch_operands = 0 : i64, tpu.core_type = #tpu.core_type<tc>, window_params = [{transform_indices = @transform_0, window_bounds = array<i64: 8, 32>}, {pipeline_mode = #tpu.pipeline_mode<synchronous>, transform_indices = @transform_1, window_bounds = array<i64: 32, 128>}, {pipeline_mode = #tpu.pipeline_mode<synchronous>, transform_indices = @transform_2, window_bounds = array<i64: 1, 128>}, {pipeline_mode = #tpu.pipeline_mode<synchronous>, transform_indices = @transform_3, window_bounds = array<i64: 128, 128>}, {pipeline_mode = #tpu.pipeline_mode<synchronous>, transform_indices = @transform_4, window_bounds = array<i64: 1, 128>}, {transform_indices = @transform_5, window_bounds = array<i64: 8, 128>}]} {
    %c0 = arith.constant 0 : index
    %c0_0 = arith.constant 0 : index
    %0 = vector.load %arg2[%c0, %c0_0] : memref<8x32xf32, #tpu.memory_space<vmem>>, vector<8x32xf32>
    %1 = arith.truncf %0 : vector<8x32xf32> to vector<8x32xbf16>
    %c0_1 = arith.constant 0 : index
    %c0_2 = arith.constant 0 : index
    %2 = vector.load %arg3[%c0_1, %c0_2] : memref<32x128xf32, #tpu.memory_space<vmem>>, vector<32x128xf32>
    %3 = arith.truncf %2 : vector<32x128xf32> to vector<32x128xbf16>
    %cst = arith.constant dense<0.000000e+00> : vector<8x128xf32>
    %4 = tpu.matmul %1, %3, %cst {dimension_numbers = #tpu.dot_dimension_numbers<[1], [0], [0], [1], [0, 0, 1, 1], [], []>} : vector<8x32xbf16>, vector<32x128xbf16>, vector<8x128xf32> -> vector<8x128xf32>
    %c0_3 = arith.constant 0 : index
    %c0_4 = arith.constant 0 : index
    %5 = vector.load %arg4[%c0_3, %c0_4] : memref<1x128xf32, #tpu.memory_space<vmem>>, vector<1x128xf32>
    %6 = vector.broadcast %5 : vector<1x128xf32> to vector<8x128xf32>
    %7 = arith.addf %4, %6 : vector<8x128xf32>
    %cst_5 = arith.constant 5.000000e-01 : f32
    %8 = vector.broadcast %cst_5 : f32 to vector<8x128xf32>
    %9 = arith.mulf %8, %7 : vector<8x128xf32>
    %cst_6 = arith.constant 0.707106769 : f32
    %10 = vector.broadcast %cst_6 : f32 to vector<8x128xf32>
    %11 = arith.mulf %7, %10 : vector<8x128xf32>
    %12 = math.erf %11 : vector<8x128xf32>
    %cst_7 = arith.constant 1.000000e+00 : f32
    %13 = vector.broadcast %cst_7 : f32 to vector<8x128xf32>
    %14 = arith.addf %13, %12 : vector<8x128xf32>
    %15 = arith.mulf %9, %14 : vector<8x128xf32>
    %16 = arith.truncf %15 : vector<8x128xf32> to vector<8x128xbf16>
    %c0_8 = arith.constant 0 : index
    %c0_9 = arith.constant 0 : index
    %17 = vector.load %arg5[%c0_8, %c0_9] : memref<128x128xf32, #tpu.memory_space<vmem>>, vector<128x128xf32>
    %18 = arith.truncf %17 : vector<128x128xf32> to vector<128x128xbf16>
    %cst_10 = arith.constant dense<0.000000e+00> : vector<8x128xf32>
    %19 = tpu.matmul %16, %18, %cst_10 {dimension_numbers = #tpu.dot_dimension_numbers<[1], [0], [0], [1], [0, 0, 1, 1], [], []>} : vector<8x128xbf16>, vector<128x128xbf16>, vector<8x128xf32> -> vector<8x128xf32>
    %c0_11 = arith.constant 0 : index
    %c0_12 = arith.constant 0 : index
    %20 = vector.load %arg6[%c0_11, %c0_12] : memref<1x128xf32, #tpu.memory_space<vmem>>, vector<1x128xf32>
    %21 = vector.broadcast %20 : vector<1x128xf32> to vector<8x128xf32>
    %22 = arith.addf %19, %21 : vector<8x128xf32>
    %c0_13 = arith.constant 0 : index
    %c0_14 = arith.constant 0 : index
    %23 = vector.load %arg7[%c0_13, %c0_14] : memref<8x128xf32, #tpu.memory_space<vmem>>, vector<8x128xf32>
    tpu.vector_store %arg7[%c0_13, %c0_14], %22 {strides = array<i32>} : memref<8x128xf32, #tpu.memory_space<vmem>>, vector<8x128xf32>,
    return
  }
  func.func @transform_0(%arg0: i32, %arg1: i32) -> (i32, i32) {
    %c0_i32 = arith.constant 0 : i32
    %c0_i32_0 = arith.constant 0 : i32
    return %arg1, %c0_i32 : i32, i32
  }
  func.func @transform_1(%arg0: i32, %arg1: i32) -> (i32, i32) {
    %c0_i32 = arith.constant 0 : i32
    %c0_i32_0 = arith.constant 0 : i32
    %c0_i32_1 = arith.constant 0 : i32
    return %c0_i32, %c0_i32_0 : i32, i32
  }
  func.func @transform_2(%arg0: i32, %arg1: i32) -> (i32, i32) {
    %c0_i32 = arith.constant 0 : i32
    %c0_i32_0 = arith.constant 0 : i32
    %c0_i32_1 = arith.constant 0 : i32
    return %c0_i32, %c0_i32_0 : i32, i32
  }
  func.func @transform_3(%arg0: i32, %arg1: i32) -> (i32, i32) {
    %c0_i32 = arith.constant 0 : i32
    %c0_i32_0 = arith.constant 0 : i32
    return %c0_i32, %arg0 : i32, i32
  }
  func.func @transform_4(%arg0: i32, %arg1: i32) -> (i32, i32) {
    %c0_i32 = arith.constant 0 : i32
    %c0_i32_0 = arith.constant 0 : i32
    return %c0_i32, %arg0 : i32, i32
  }
  func.func @transform_5(%arg0: i32, %arg1: i32) -> (i32, i32) {
    %c0_i32 = arith.constant 0 : i32
    return %arg1, %arg0 : i32, i32
  }
}

</mosaic_0001>

<bundles_post_ra>
// kernel: timestep_embedding.1
= control target key start
LH: loop header
LB: loop body
LE: loop exit
PB: predicated region body
PF: predicated region fallthrough
CT: control target
= control target key end

     0   :  { %10 = vsyncpa [#allocation3], 0  ;;  %s369_s0 = inlined_call_operand.hbm [shape: f32[8,32], index: 0, kind: input, shape index: {}]   ;;  %s370_s1 = inlined_call_operand.hbm [shape: f32[32,128], index: 1, kind: input, shape index: {}]   ;;  %s371_s2 = inlined_call_operand.vmem [shape: f32[1,128], index: 2, kind: input, shape index: {}]   ;;  %s372_s3 = inlined_call_operand.hbm [shape: f32[128,128], index: 3, kind: input, shape index: {}]   ;;  %s373_s4 = inlined_call_operand.vmem [shape: f32[1,128], index: 4, kind: input, shape index: {}]   ;;  %s374_s5 = inlined_call_operand.hbm [shape: f32[8,128], index: 5, kind: output, shape index: {}]  }
   0x1   :  { %11 = vsyncpa [#allocation6], 0  ;;  %s28_s20 = sshll.u32 %s370_s1, 4  ;;  %s29_s20 = int_to_ptr.hbm [resolvable:$true] %s28_s20 }
   0x2   :  { %12 = vsyncpa [#allocation4], 0  ;;  %s315_s21 = smov [#allocation5]   ;;  %s18_s25 = sshll.u32 %s369_s0, 4  ;;  %s19_s25 = int_to_ptr.hbm [resolvable:$true] %s18_s25 }
   0x3   :  { %s30_s22 = sshll.u32 %s315_s21, 4  ;;  %s316_s26 = smov 128   ;;  %s31_s22 = int_to_ptr.vmem [resolvable:$true] %s30_s22 }
   0x4   :  { %s317_s27 = smov 8   ;;  %s318_s28 = smov [#allocation2]  }
   0x5   :  { %36 = dma.hbm_to_vmem [thread:$0]  %s29_s20, 512, %s31_s22, [#allocation6], %s316_s26, %s316_s26, %s317_s27  }
   0x6   :  { %s20_s29 = sshll.u32 %s318_s28, 4  ;;  %s43_s7 = sshll.u32 %s372_s3, 4  ;;  %s21_s29 = int_to_ptr.vmem [resolvable:$true] %s20_s29  ;;  %s44_s7 = int_to_ptr.hbm [resolvable:$true] %s43_s7 }
   0x7   :  { %23 = dma.hbm_to_vmem [thread:$0]  %s19_s25, 128, %s21_s29, [#allocation3]  }
   0x8   :  { %s319_s1 = smov [#allocation7]  }
   0x9   :  { %s45_s8 = sshll.u32 %s319_s1, 4  ;;  %s46_s8 = int_to_ptr.vmem [resolvable:$true] %s45_s8 }
   0xa   :  { %51 = dma.hbm_to_vmem [thread:$0]  %s44_s7, 2048, %s46_s8, [#allocation6], %s316_s26, %s316_s26, %s317_s27  }
   0xb   :  { %309 = dma.done.wait [#allocation3], 128  }
   0xc   :  { %310 = vsyncadd [#allocation3], 4294967168 }
   0xd   :  { %311 = dma.done.wait [#allocation6], 2560  }
   0xe   :  { %312 = vsyncadd [#allocation6], 4294964736  ;;  %v71_v0 = vld [vmem:[#allocation5 + $0x10] sm:$0xff]  ;;  %v72_v1 = vld [vmem:[#allocation5 + $0x18] sm:$0xff]  ;;  %vm79_vm0 = vcmask 261120   ;;  %s320_s10 = smov [#allocation8]  }
   0xf   :  { %v69_v2 = vld [vmem:[#allocation5] sm:$0xff]  ;;  %v74_v3 = vpack.c.bf16 %v72_v1, %v71_v0  ;;  %v70_v4 = vld [vmem:[#allocation5 + $0x8] sm:$0xff]  ;;  %v67_v6 = vld [vmem:[#allocation2] sm:$0xff]  ;;  %s188_s11 = sshll.u32 %s320_s10, 4  ;;  %s190_s14 = sshll.u32 %s374_s5, 4  ;;  %s189_s11 = int_to_ptr.vmem [resolvable:$true] %s188_s11  ;;  %s191_s14 = int_to_ptr.hbm [resolvable:$true] %s190_s14 }
  0x10   :  { %v73_v5 = vpack.c.bf16 %v70_v4, %v69_v2  ;;  %v68_v7 = vpack.c.bf16 %v67_v6, %v67_v6  ;;  %v155_v8 = vld [vmem:[#allocation7 + $0x70] sm:$0xff]  ;;  %v156_v9 = vld [vmem:[#allocation7 + $0x78] sm:$0xff]  ;;  %v153_v11 = vld [vmem:[#allocation7 + $0x60] sm:$0xff] }
  0x11   :  { %89 = vmatpush.bf16.msra.mxu0 %v74_v3  ;;  %v164_v10 = vpack.c.bf16 %v156_v9, %v155_v8  ;;  %v154_v12 = vld [vmem:[#allocation7 + $0x68] sm:$0xff]  ;;  %v209_v14 = vld [vmem:[%s371_s2] ss:$0 sm:$0xff]  ;;  %v151_v15 = vld [vmem:[#allocation7 + $0x50] sm:$0xff] }
  0x12   :  { %v163_v13 = vpack.c.bf16 %v154_v12, %v153_v11  ;;  %v152_v16 = vld [vmem:[#allocation7 + $0x58] sm:$0xff]  ;;  %v149_v18 = vld [vmem:[#allocation7 + $0x40] sm:$0xff]  ;;  %v150_v19 = vld [vmem:[#allocation7 + $0x48] sm:$0xff] }
  0x13   :  { %169 = vmatpush.bf16.msra.mxu1 %v164_v10  ;;  %v162_v17 = vpack.c.bf16 %v152_v16, %v151_v15  ;;  %v161_v22 = vpack.c.bf16 %v150_v19, %v149_v18  ;;  %v147_v23 = vld [vmem:[#allocation7 + $0x30] sm:$0xff]  ;;  %v148_v24 = vld [vmem:[#allocation7 + $0x38] sm:$0xff]  ;;  %v145_v28 = vld [vmem:[#allocation7 + $0x20] sm:$0xff] }
  0x14   :  { %v160_v27 = vpack.c.bf16 %v148_v24, %v147_v23  ;;  %v146_v29 = vld [vmem:[#allocation7 + $0x28] sm:$0xff]  ;;  %v143_v35 = vld [vmem:[#allocation7 + $0x10] sm:$0xff]  ;;  %v144_v36 = vld [vmem:[#allocation7 + $0x18] sm:$0xff] }
  0x15   :  { %90 = vmatpush.bf16.msra.mxu0 %v73_v5  ;;  %v159_v33 = vpack.c.bf16 %v146_v29, %v145_v28  ;;  %v158_v40 = vpack.c.bf16 %v144_v36, %v143_v35  ;;  %v141_v42 = vld [vmem:[#allocation7] sm:$0xff]  ;;  %v142_v43 = vld [vmem:[#allocation7 + $0x8] sm:$0xff]  ;;  %v210_v12 = vld [vmem:[%s373_s4] ss:$0 sm:$0xff] }
  0x16   :  { %v157_v46 = vpack.c.bf16 %v142_v43, %v141_v42 }
  0x17   :  { %170 = vmatpush.bf16.msra.mxu1 %v163_v13 }
  0x18   :  { %201 = vmatmul.msk.bf16.vlgmr.msra.gmra.mxu0 %vm79_vm0, %v68_v7 }
  0x1b   :  { %171 = vmatpush.bf16.msra.mxu1 %v162_v17 }
  0x1f   :  { %172 = vmatpush.bf16.msra.mxu1 %v161_v22 }
  0x23   :  { %173 = vmatpush.bf16.msra.mxu1 %v160_v27 }
  0x27   :  { %174 = vmatpush.bf16.msra.mxu1 %v159_v33 }
  0x2b   :  { %175 = vmatpush.bf16.msra.mxu1 %v158_v40 }
  0x2f   :  { %176 = vmatpush.bf16.msra.mxu1 %v157_v46 }
  0x95   :  { %v92_v20 = vpop.f32.mrf.mxu0 }
  0x96   :  { %v93_v21 = vadd.f32 %v209_v14, %v92_v20 }
  0x98   :  { %v97_v25 = vmul.f32 0.70710677, %v93_v21  ;;  %v96_v8 = vmul.f32 0.5, %v93_v21 }
  0x9a   :  { %v98_v26 = vmul.f32 %v97_v25, %v97_v25 }
  0x9c   :  { %v99_v30 = vmin.f32 %v98_v26, 16.0 }
  0x9d   :  { %v94_v31 = vpop.f32.mrf.mxu0 }
  0x9e   :  { %v100_v32 = vmul.f32 2.1237322e-06, %v99_v30  ;;  %v111_v34 = vmul.f32 3.8918573e-05, %v99_v30 }
  0xa0   :  { %v101_v37 = vadd.f32 0.00028619796, %v100_v32  ;;  %v112_v38 = vadd.f32 0.001143296, %v111_v34 }
  0xa2   :  { %v102_v39 = vmul.f32 %v101_v37, %v99_v30  ;;  %v113_v41 = vmul.f32 %v112_v38, %v99_v30 }
  0xa4   :  { %v114_v44 = vadd.f32 0.014752088, %v113_v41  ;;  %v103_v45 = vadd.f32 0.0036580483, %v102_v39 }
  0xa6   :  { %v115_v47 = vmul.f32 %v114_v44, %v99_v30  ;;  %v104_v49 = vmul.f32 %v103_v45, %v99_v30 }
  0xa8   :  { %v116_v48 = vadd.f32 0.112945676, %v115_v47  ;;  %v105_v52 = vadd.f32 0.05243302, %v104_v49 }
  0xaa   :  { %v117_v50 = vmul.f32 %v116_v48, %v99_v30  ;;  %v106_v55 = vmul.f32 %v105_v52, %v99_v30 }
  0xac   :  { %v118_v51 = vadd.f32 0.4994258, %v117_v50  ;;  %v107_v56 = vadd.f32 0.18741608, %v106_v55 }
  0xae   :  { %v119_v53 = vmul.f32 %v118_v51, %v99_v30  ;;  %v108_v58 = vmul.f32 %v107_v56, %v99_v30 }
  0xb0   :  { %v120_v54 = vadd.f32 1.0, %v119_v53  ;;  %v109_v62 = vadd.f32 1.1283791, %v108_v58 }
  0xb2   :  { %211 = vrcp.f32 %v120_v54  ;;  %v132_v61 = vand.u32 2147483648, %v120_v54  ;;  %v130_v0 = vand.u32 2147483647, %v120_v54  ;;  %vm126_vm2 = vweird.f32 %v120_v54 }
  0xb3   :  { %v110_v3 = vmul.f32 %v109_v62, %v97_v25 }
  0xb4   :  { %v133_v2 = vor.u32 1.1754944e-38, %v132_v61  ;;  %vm131_vm4 = vcmp.eq.f32.partialorder %v130_v0, 8.507059e+37 }
  0xb8   :  { %v212_v57 = vpop.eup %211 }
  0xb9   :  { %v122_v59 = vmul.f32 %v212_v57, %v120_v54  ;;  %vm127_vm1 = vweird.f32 %v212_v57 }
  0xba   :  { %vm128_vm3 = vmor %vm126_vm2, %vm127_vm1 }
  0xbb   :  { %v123_v60 = vsub.f32 1.0, %v122_v59 }
  0xbd   :  { %v124_v63 = vmul.f32 %v212_v57, %v123_v60 }
  0xbf   :  { %v125_v1 = vadd.f32 %v212_v57, %v124_v63 }
  0xc1   :  { %v129_v4 = vsel %vm128_vm3, %v212_v57, %v125_v1 }
  0xc2   :  { %v134_v5 = vsel %vm131_vm4, %v133_v2, %v129_v4 }
  0xc3   :  { %v135_v6 = vmul.f32 %v134_v5, %v110_v3 }
  0xc5   :  { %v202_v7 = vclamps-f32 %v135_v6, 1.0 }
  0xc7   :  { %v138_v9 = vadd.f32 1.0, %v202_v7 }
  0xc9   :  { %v139_v10 = vmul.f32 %v138_v9, %v96_v8 }
  0xcb   :  { %v140_v11 = vpack.c.bf16 %v139_v10, %v139_v10 }
  0xcd   :  { %177 = vmatmul.bf16.vlgmr.msra.gmra.mxu1 %v140_v11 }
 0x14a   :  { %v178_v13 = vpop.f32.mrf.mxu1 }
 0x14b   :  { %v179_v14 = vadd.f32 %v210_v12, %v178_v13 }
 0x14d   :  { %182 = vst [vmem:[#allocation8] sm:$0xff] %v179_v14 }
 0x14e   :  { %193 = dma.vmem_to_hbm [thread:$0]  %s189_s11, 128, %s191_s14, [#allocation4]  }
 0x152   :  { %v180_v15 = vpop.f32.mrf.mxu1 }
 0x153   :  { %313 = dma.done.wait [#allocation4], 128  }
 0x154   :  { %314 = vsyncadd [#allocation4], 4294967168 }
 0x155   :  { %198 = vsyncpa [#allocation3], 1 }
 0x156   :  { %199 = vsyncpa [#allocation6], 1 }
 0x157   :  { %200 = vsyncpa [#allocation4], 1 }

</bundles_post_ra>
